<compile_context>
chip_gen: v6e
topology: v6e:2x2x1
jax: 0.10.0
libtpu: 0.0.40
codegen_flags: <defaults>
</compile_context>

<pallas_src>
import math
import functools

import jax
import jax.numpy as jnp
from jax import lax
from jax.experimental import pallas as pl
from jax.experimental.pallas import tpu as pltpu


# --------------------------- PE table (setup) ------------------------------ #

def make_positional_encodings(hidden_dim: int, max_len: int = 1000) -> jnp.ndarray:
    """Deterministic buffer, identical to the PyTorch __init__ logic."""
    position = jnp.arange(0, max_len, dtype=jnp.float32)[:, None]            # (max_len, 1)
    div_term = jnp.exp(
        jnp.arange(0, hidden_dim, 2, dtype=jnp.float32)
        * (-math.log(10000.0) / hidden_dim)
    )                                                                         # (H//2,)
    pe = jnp.zeros((max_len, hidden_dim), dtype=jnp.float32)
    pe = pe.at[:, 0::2].set(jnp.sin(position * div_term))
    pe = pe.at[:, 1::2].set(jnp.cos(position * div_term))
    return pe                                                                 # (max_len, H)


# ------------------------------- kernels ----------------------------------- #

def _pe_add_kernel(x_ref, pe_ref, o_ref):
    # eval-mode / p == 0 path: dropout is identity
    o_ref[...] = x_ref[...] + pe_ref[...]        # (tB, tC) + (1, tC) broadcast


def _pe_add_dropout_kernel(seed_ref, x_ref, pe_ref, o_ref, *, p):
    # training-mode path: inverted dropout via a stateless counter-hash PRNG.
    # Stateless => every grid step is independent ("parallel" safe).
    y = x_ref[...] + pe_ref[...]
    tB, tC = o_ref.shape

    c = pl.program_id(0)                 # column-block (outer grid axis)
    b = pl.program_id(1)                 # batch-block  (inner grid axis)
    n_c = pl.num_programs(0)

    # Unique per-element counter over the whole (B, S*H) array, built entirely
    # in uint32 (no int32 overflow for large tensors; uint32 mul/add wrap).
    row = lax.broadcasted_iota(jnp.int32, (tB, tC), 0).astype(jnp.uint32) \
        + b.astype(jnp.uint32) * jnp.uint32(tB)
    col = lax.broadcasted_iota(jnp.int32, (tB, tC), 1).astype(jnp.uint32) \
        + c.astype(jnp.uint32) * jnp.uint32(tC)
    stride = jnp.uint32(n_c * tC) if isinstance(n_c, int) else \
        n_c.astype(jnp.uint32) * jnp.uint32(tC)
    ctr = row * stride + col

    seed_u = seed_ref[0].astype(jnp.uint32)
    # Single murmur3-style finalizer round (dropout needs decorrelation, not
    # crypto quality); ~half the VALU cost of the previous double mix.
    h = ctr ^ (seed_u * jnp.uint32(0x9E3779B9)) ^ jnp.uint32(0x85EBCA6B)
    h = h ^ (h >> jnp.uint32(16))
    h = h * jnp.uint32(0x7FEB352D)
    h = h ^ (h >> jnp.uint32(15))
    h = h * jnp.uint32(0x846CA68B)
    h = h ^ (h >> jnp.uint32(16))
    # TODO(synk): on TPU-only builds, pltpu.prng_seed + pltpu.prng_random_bits
    # would offload this to the hardware PRNG entirely.

    # Integer-domain threshold: drop iff bits < round(p * 2^32).
    thresh = jnp.uint32(min(int(round(p * 4294967296.0)), 0xFFFFFFFF))
    keep = h >= thresh
    scale = jnp.float32(1.0 / (1.0 - p))
    o_ref[...] = jnp.where(keep, y * scale, jnp.zeros_like(y))


# ------------------------------- tiling ------------------------------------ #

_LANE = 128
_SUBLANE = 8
_TARGET_BLOCK_BYTES = 2 * 1024 * 1024    # ~2 MiB x/out blocks: 85%+ of HBM roofline,
                                         # ~8.5 MiB live (double-buffered) -> fits v7x


def _pick_tiles(B, L, itemsize):
    """Byte-budgeted (tB, tC) for the flattened (B, L) view."""
    target_elems = max(_LANE, _TARGET_BLOCK_BYTES // itemsize)

    # Minimal legal batch tile (sublane rule: multiple of 8 or full dim).
    tb_unit = B if B <= _SUBLANE else _SUBLANE
    cols_budget = max(_LANE, target_elems // tb_unit)

    if L <= cols_budget:
        # Whole row fits; spend the remaining budget on more batch rows.
        tC = L
        rows = max(1, target_elems // max(1, tC))
        if rows >= B or B <= _SUBLANE:
            tB = B
        else:
            tB = min(B, max(_SUBLANE, (rows // _SUBLANE) * _SUBLANE))
    else:
        # Cap columns at a 128-multiple (legal even when L % 128 != 0;
        # the trailing partial block is masked on store).
        tC = max(_LANE, (cols_budget // _LANE) * _LANE)
        tB = tb_unit
        # TODO(synk): if L % 128 != 0 and this path is hot, pad L to a 128
        # multiple in the wrapper to keep the tail stores full-width vst.

    # Guarantee >= 2 grid steps so v7x's two TensorCores both get work.
    n_steps = pl.cdiv(B, tB) * pl.cdiv(L, tC)
    if n_steps < 2:
        if tC > _LANE:
            tC = ((tC // 2 + _LANE - 1) // _LANE) * _LANE     # stays a 128-multiple
        elif B >= 2 * _SUBLANE:
            tB = max(_SUBLANE, ((B // 2) // _SUBLANE) * _SUBLANE)
        # else: tiny single-block input; a 1-step grid is still correct.
    return tB, tC


# ------------------------------- wrapper ------------------------------------ #

def positional_encoding_forward(x, pe_table, *, dropout_p=0.0, training=False,
                                seed=0, min_pallas_bytes=1 << 20):
    """x: (B, S, H).  pe_table: (max_len, H) float32."""
    B, S, H = x.shape
    max_len, Hp = pe_table.shape
    assert Hp == H and S <= max_len
    L = S * H
    use_dropout = training and dropout_p > 0.0

    # PyTorch Dropout(p=1.0) in training zeroes everything (and 1/(1-p) blows up).
    if use_dropout and dropout_p >= 1.0:
        return jnp.zeros_like(x)

    total_bytes = B * L * x.dtype.itemsize
    if total_bytes < min_pallas_bytes:
        # KiB-scale inputs: pallas_call launch + pipeline prologue dwarfs the
        # HBM traffic; let XLA fuse the elementwise math instead.
        y = x + pe_table[None, :S, :].astype(x.dtype)
        if use_dropout:
            keep = jax.random.bernoulli(jax.random.PRNGKey(seed),
                                        1.0 - dropout_p, y.shape)
            y = jnp.where(keep, y / (1.0 - dropout_p), jnp.zeros_like(y))
        return y

    x2 = x.reshape(B, L)                          # contiguous -> free bitcast
    if L % _LANE == 0:
        # Pass the whole table (flattened, free) and let the BlockSpec select
        # the first S*H columns -> no per-call HBM slice copy.  NOTE: if the
        # last column block is partial (L % tC != 0) it reads PE data beyond
        # S*H; that is harmless because the matching x/out lanes are OOB and
        # masked on store.
        pe2 = pe_table.reshape(1, max_len * H)
    else:
        # Slice so the pe block's last dim matches x's flattened columns.
        pe2 = pe_table[:S].reshape(1, L)
    pe2 = pe2.astype(x.dtype)

    itemsize = x.dtype.itemsize
    tB, tC = _pick_tiles(B, L, itemsize)
    grid = (pl.cdiv(L, tC), pl.cdiv(B, tB))       # column-block outer, batch inner
                                                  # (PE block index constant on inner axis)

    # index_maps take *_ so they work with and without scalar-prefetch args.
    x_spec = pl.BlockSpec((tB, tC), lambda c, b, *_: (b, c))
    pe_spec = pl.BlockSpec((1, tC), lambda c, b, *_: (0, c))
    out_shape = jax.ShapeDtypeStruct((B, L), x.dtype)

    live_bytes = 2 * (2 * tB * tC + tC) * itemsize          # double-buffered in/out + pe
    vmem_limit = int(min(48 << 20, max(32 << 20, 2 * live_bytes)))  # safe on v5e/v6e/v7x
    bytes_accessed = int((2 * B * L) * itemsize + pl.cdiv(L, tC) * tC * itemsize)
    compiler_params = pltpu.CompilerParams(
        dimension_semantics=("parallel", "parallel"),
        vmem_limit_bytes=vmem_limit,
    )

    if not use_dropout:
        out2 = pl.pallas_call(
            _pe_add_kernel,
            out_shape=out_shape,
            grid_spec=pltpu.PrefetchScalarGridSpec(
                num_scalar_prefetch=0,
                grid=grid,
                in_specs=[x_spec, pe_spec],
                out_specs=x_spec,
            ),
            compiler_params=compiler_params,
            cost_estimate=pl.CostEstimate(
                flops=int(B * L), transcendentals=0, bytes_accessed=bytes_accessed),
        )(x2, pe2)
    else:
        seed_arr = jnp.asarray([seed], dtype=jnp.int32)
        out2 = pl.pallas_call(
            functools.partial(_pe_add_dropout_kernel, p=float(dropout_p)),
            out_shape=out_shape,
            grid_spec=pltpu.PrefetchScalarGridSpec(
                num_scalar_prefetch=1,
                grid=grid,
                in_specs=[x_spec, pe_spec],
                out_specs=x_spec,
            ),
            compiler_params=compiler_params,
            cost_estimate=pl.CostEstimate(
                flops=int(20 * B * L), transcendentals=0,
                bytes_accessed=bytes_accessed),
        )(seed_arr, x2, pe2)

    return out2.reshape(B, S, H)


# --------------------------------- main ------------------------------------- #

if __name__ == "__main__":
    B, S, H = 2, 8, 32
    dropout_p = 0.1  # module hyperparameter; identity in eval mode

    key = jax.random.PRNGKey(0)
    x = jax.random.normal(key, (B, S, H), dtype=jnp.float32)

    pe_table = make_positional_encodings(H, max_len=1000)

    # eval-mode forward (dropout is identity), matches PyTorch module.eval().
    # min_pallas_bytes=0 forces the Pallas path at this tiny demo shape.
    out = positional_encoding_forward(
        x, pe_table, dropout_p=dropout_p, training=False, min_pallas_bytes=0)
    out = jax.block_until_ready(out)

    ref = x + pe_table[None, :S, :]
    assert out.shape == (B, S, H)
    assert jnp.allclose(out, ref, atol=1e-6), "mismatch vs reference (eval path)"

    # training-mode (dropout) kernel: every element must be 0 or (x+pe)/(1-p)
    out_train = positional_encoding_forward(
        x, pe_table, dropout_p=dropout_p, training=True, seed=123,
        min_pallas_bytes=0)
    out_train = jax.block_until_ready(out_train)
    assert out_train.shape == (B, S, H)
    scaled = ref / (1.0 - dropout_p)
    structural_ok = jnp.isclose(out_train, scaled, atol=1e-5, rtol=1e-5) | (out_train == 0.0)
    assert bool(jnp.all(structural_ok)), "dropout output not {0, scaled} structured"

    print("KERNEL_OK")
</pallas_src>

<mosaic_0001>
module attributes {stable_mosaic.version = 11 : i64} {
  func.func @_pe_add_kernel(%arg0: i32, %arg1: i32, %arg2: memref<2x128xf32, #tpu.memory_space<vmem>>, %arg3: memref<1x128xf32, #tpu.memory_space<vmem>>, %arg4: memref<2x128xf32, #tpu.memory_space<vmem>>) attributes {dimension_semantics = [#tpu.dimension_semantics<parallel>, #tpu.dimension_semantics<parallel>], iteration_bounds = array<i64: 2, 1>, scalar_prefetch = 0 : i64, scratch_operands = 0 : i64, tpu.core_type = #tpu.core_type<tc>, window_params = [{transform_indices = @transform_0, window_bounds = array<i64: 2, 128>}, {transform_indices = @transform_1, window_bounds = array<i64: 1, 128>}, {transform_indices = @transform_2, window_bounds = array<i64: 2, 128>}]} {
    %c0 = arith.constant 0 : index
    %c0_0 = arith.constant 0 : index
    %0 = vector.load %arg2[%c0, %c0_0] : memref<2x128xf32, #tpu.memory_space<vmem>>, vector<2x128xf32>
    %c0_1 = arith.constant 0 : index
    %c0_2 = arith.constant 0 : index
    %1 = vector.load %arg3[%c0_1, %c0_2] : memref<1x128xf32, #tpu.memory_space<vmem>>, vector<1x128xf32>
    %2 = vector.broadcast %1 : vector<1x128xf32> to vector<2x128xf32>
    %3 = arith.addf %0, %2 : vector<2x128xf32>
    %c0_3 = arith.constant 0 : index
    %c0_4 = arith.constant 0 : index
    %4 = vector.load %arg4[%c0_3, %c0_4] : memref<2x128xf32, #tpu.memory_space<vmem>>, vector<2x128xf32>
    tpu.vector_store %arg4[%c0_3, %c0_4], %3 {strides = array<i32>} : memref<2x128xf32, #tpu.memory_space<vmem>>, vector<2x128xf32>,
    return
  }
  func.func @transform_0(%arg0: i32, %arg1: i32) -> (i32, i32) {
    %c0_i32 = arith.constant 0 : i32
    return %arg1, %arg0 : i32, i32
  }
  func.func @transform_1(%arg0: i32, %arg1: i32) -> (i32, i32) {
    %c0_i32 = arith.constant 0 : i32
    %c0_i32_0 = arith.constant 0 : i32
    return %c0_i32, %arg0 : i32, i32
  }
  func.func @transform_2(%arg0: i32, %arg1: i32) -> (i32, i32) {
    %c0_i32 = arith.constant 0 : i32
    return %arg1, %arg0 : i32, i32
  }
}

</mosaic_0001>

<bundles_post_ra>
// kernel: tpu_custom_call.1
= control target key start
LH: loop header
LB: loop body
LE: loop exit
PB: predicated region body
PF: predicated region fallthrough
CT: control target
= control target key end

     0   :  { %7 = vsyncpa [#allocation3], 0  ;;  %s745_s0 = inlined_call_operand.hbm [shape: f32[2,256], index: 0, kind: input, shape index: {}]   ;;  %s746_s1 = inlined_call_operand.hbm [shape: f32[1,32000], index: 1, kind: input, shape index: {}]   ;;  %s747_s2 = inlined_call_operand.hbm [shape: f32[2,256], index: 2, kind: output, shape index: {}]  }
   0x1   :  { %9 = vsyncpa [#allocation3 + $0x1], 0 }
   0x2   :  { %10 = vsyncpa [#allocation6], 0 }
   0x3   :  { %12 = vsyncpa [#allocation6 + $0x1], 0 }
   0x4   :  { %13 = vsyncpa [#allocation4], 0 }
   0x5   :  { %15 = vsyncpa [#allocation4 + $0x1], 0  ;;  %s581_s9 = smov 0   ;;  %s583_s10 = smov 0  }
   0x6   :  { %s585_s11 = smov 0   ;;  %s587_s12 = smov 0  }
   0x7   :  { %s589_s13 = smov 0   ;;  %s591_s14 = smov 0  }
   0x8 LB: > { %s339_s15 = sadd.s32 4294967295, %s561_s14   ;;  %s340_s16 = sadd.s32 4294967294, %s561_s14   ;;  %s561_s14 = sphi %s591_s14, %s21_s14   ;;  %s557_s13 = sphi %s589_s13, %s759_s13   ;;  %s553_s12 = sphi %s587_s12, %s758_s12   ;;  %s549_s11 = sphi %s585_s11, %s757_s11   ;;  %s545_s10 = sphi %s583_s10, %s756_s10   ;;  %s541_s9 = sphi %s581_s9, %s755_s9  }
   0x9   : > { %s33_s17 = sadd.s32 1, %s557_s13  ;;  %s42_s18 = sadd.s32 1, %s549_s11 }
   0xa   : > { %p35_p0 = scmp.ge.s32.totalorder %s33_s17, 2  ;;  %p49_p1 = scmp.ne.s32.totalorder %s549_s11, %s545_s10 }
   0xb   : > { %p50_p2 = scmp.eq.s32.totalorder %s561_s14, 0  ;;  %p55_p3 = scmp.ne.s32.totalorder %s545_s10, %s541_s9 }
   0xc   : > { %s761_s17 = smov (%p35_p0, %s33_s17), 0  ;;  %p56_p5 = scmp.eq.s32.totalorder %s339_s15, 0 }
   0xd   : > { %p622_p4 = por %p50_p2, %p49_p1  ;;  %s38_s20 = ssub.s32 %s557_s13, %s761_s17 }
   0xe   : > { %p107_p6 = scmp.eq.s32.totalorder %s339_s15, 1  ;;  %p40_p7 = scmp.eq.s32.totalorder %s38_s20, 0 }
   0xf   : > { %p628_p8 = por %p56_p5, %p55_p3  ;;  %p113_p10 = scmp.eq.s32.totalorder %s340_s16, 1 }
  0x10   : > { %p632_p9 = por %p107_p6, %p49_p1  ;;  %p371_p13 = scmp.lt.s32.totalorder %s561_s14, 2 }
  0x11   : > { %s637_s23 = scalar_select %p40_p7, %s549_s11, %s42_s18  }
  0x12   : > { %p639_p11 = por %p113_p10, %p55_p3  ;;  %s646_s25 = sand.u32 1, %s549_s11  }
  0x13   : > { %s343_s26 = sshll.u32 %s646_s25, 1  ;;  %s344_s27 = sshll.u32 %s557_s13, 5 }
  0x14   : > { %s144_s30 = scalar_lea.hbm %s745_s0, %s344_s27  ;;  %s137_s3 = scalar_lea.vmem [#allocation2], %s343_s26 }
  0x15   : > { %s146_s4 = sshll.u32 %s137_s3, 4  ;;  %p655_p0 = pnand %p371_p13, %p622_p4  ;;  %s147_s4 = int_to_ptr.vmem [resolvable:$true] %s146_s4 }
  0x16   : > { %p346_p1 = scmp.ge.s32.totalorder %s561_s14, 1  ;;  %p168_p2 = scmp.lt.s32.totalorder %s561_s14, 3 }
  0x17   : > { %s134_s6 = scalar_lea.sflag [#allocation3], %s646_s25  ;;  %p423_p3 = pneg %p655_p0 }
  0x18   : > { %s434_s7 = scalar_lea.vmem %s147_s4, 32  ;;  %s563_s8 = smov [#allocation2]  }
  0x19   : > { %p435_p5 = scmp.ne.s32.totalorder %s147_s4, %s434_s7  ;;  %s439_s15 = sshll.u32 %s563_s8, 4  ;;  %s440_s15 = int_to_ptr.vmem [resolvable:$false] %s439_s15 }
  0x1a   : > { %s441_s16 = scalar_lea.vmem %s440_s15, 64  ;;  %p442_p4 = scmp.lt.s32.totalorder %s147_s4, %s440_s15 }
  0x1b   : > { %p437_p6 = pnand %p435_p5, %p423_p3  ;;  %p443_p10 = scmp.lt.s32.totalorder %s441_s16, %s434_s7 }
  0x1d   : > { %p438_p7 = pneg %p437_p6  ;;  %p444_p13 = por %p443_p10, %p442_p4 }
  0x1f   : > { %p445_p12 = pnand %p444_p13, %p438_p7 }
  0x21   : > { %448 = shalt.err (!%p445_p12)
}
  0x22   : > { %363 = dma.hbm_to_vmem [thread:$0]  (!%p655_p0), %s144_s30, 32, %s147_s4, %s134_s6  }
  0x23   : > { %p673_p5 = pnand %p346_p1, %p168_p2  ;;  %s345_s19 = sshll.u32 %s557_s13, 4 }
  0x24   : > { %s156_s20 = scalar_lea.vmem [#allocation5], %s646_s25  ;;  %s161_s29 = scalar_lea.hbm %s746_s1, %s345_s19 }
  0x25   : > { %s163_s26 = sshll.u32 %s156_s20, 4  ;;  %s154_s3 = scalar_lea.sflag [#allocation6], %s646_s25  ;;  %s164_s26 = int_to_ptr.vmem [resolvable:$true] %s163_s26 }
  0x26   : > { %s462_s7 = scalar_lea.vmem %s164_s26, 16  ;;  %s564_s30 = smov [#allocation5]  }
  0x27   : > { %p463_p12 = scmp.ne.s32.totalorder %s164_s26, %s462_s7  ;;  %s467_s4 = sshll.u32 %s564_s30, 4  ;;  %s468_s4 = int_to_ptr.vmem [resolvable:$false] %s467_s4 }
  0x28   : > { %s469_s6 = scalar_lea.vmem %s468_s4, 32  ;;  %p470_p1 = scmp.lt.s32.totalorder %s164_s26, %s468_s4 }
  0x29   : > { %p465_p6 = pnand %p463_p12, %p423_p3  ;;  %p471_p2 = scmp.lt.s32.totalorder %s469_s6, %s462_s7 }
  0x2b   : > { %p466_p7 = pneg %p465_p6  ;;  %p472_p4 = por %p471_p2, %p470_p1 }
  0x2d   : > { %p473_p10 = pnand %p472_p4, %p466_p7 }
  0x2f   : > { %476 = shalt.err (!%p473_p10)
}
  0x30   : > { %366 = dma.hbm_to_vmem [thread:$0]  (!%p655_p0), %s161_s29, 16, %s164_s26, %s154_s3  }
  0x31   : > { %172 = sbr.rel (%p673_p5) target bundleno = 81 (0x51), region = 28  ;;  %s691_s25 = sand.u32 (!%p673_p5), 1, %s545_s10  }
  0x32   : > { %s347_s8 = sshll.u32 (!%p673_p5), %s691_s25, 1  ;;  %s175_s15 = scalar_lea.sflag (!%p673_p5), [#allocation3], %s691_s25 }
  0x33   : > { %s178_s16 = scalar_lea.vmem (!%p673_p5), [#allocation2], %s347_s8 }
  0x36   : > { %528 = dma.done.wait (%p628_p8), %s175_s15, 32  }
  0x37   : > { %530 = vsyncadd (%p628_p8), %s175_s15, 4294967264  ;;  %s184_s5 = scalar_lea.sflag [#allocation6], %s691_s25  ;;  %s186_s18 = scalar_lea.vmem [#allocation5], %s691_s25 }
  0x38   : > { %532 = dma.done.wait (%p628_p8), %s184_s5, 16  }
  0x39   : > { %534 = vsyncadd (%p628_p8), %s184_s5, 4294967280  ;;  %s210_s19 = scalar_lea.vmem [#allocation7], %s347_s8  ;;  %s351_s26 = sshll.u32 %s553_s12, 5  ;;  %v211_v0 = vld [vmem:[%s178_s16] sm:$0x3] }
  0x3a   : > { %s237_s20 = sshll.u32 %s210_s19, 4  ;;  %v349_v1 = vld [vmem:[%s186_s18] ss:$0 sm:$0xff]  ;;  %s235_s29 = scalar_lea.hbm %s747_s2, %s351_s26  ;;  %s238_s20 = int_to_ptr.vmem [resolvable:$true] %s237_s20 }
  0x3b   : > { %v219_v2 = vadd.f32 %v349_v1, %v211_v0  ;;  %s222_s3 = scalar_lea.sflag [#allocation4], %s691_s25  ;;  %s477_s7 = scalar_lea.vmem %s238_s20, 32 }
  0x3c   : > { %p478_p0 = scmp.ne.s32.totalorder %s238_s20, %s477_s7  ;;  %s565_s21 = smov [#allocation7]  }
  0x3d   : > { %220 = vst [vmem:[%s210_s19] sm:$0x3] %v219_v2  ;;  %s481_s30 = sshll.u32 %s565_s21, 4  ;;  %s482_s30 = int_to_ptr.vmem [resolvable:$false] %s481_s30 }
  0x3e   : > { %p479_p8 = pnand %p478_p0, %p632_p9  ;;  %s483_s4 = scalar_lea.vmem %s482_s30, 64 }
  0x3f   : > { %p484_p13 = scmp.lt.s32.totalorder %s238_s20, %s482_s30  ;;  %p485_p5 = scmp.lt.s32.totalorder %s483_s4, %s477_s7 }
  0x40   : > { %p480_p3 = pneg %p479_p8 }
  0x41   : > { %p486_p12 = por %p485_p5, %p484_p13 }
  0x43   : > { %p487_p6 = pnand %p486_p12, %p480_p3 }
  0x45   : > { %490 = shalt.err (!%p487_p6)
}
  0x46   : > { %s491_s12 = scalar_lea.hbm %s235_s29, 32  ;;  %s495_s8 = scalar_lea.hbm %s747_s2, 64 }
  0x47   : > { %p492_p7 = scmp.ne.s32.totalorder %s235_s29, %s491_s12  ;;  %p496_p4 = scmp.lt.s32.totalorder %s235_s29, %s747_s2 }
  0x48   : > { %p497_p10 = scmp.lt.s32.totalorder %s495_s8, %s491_s12 }
  0x49   : > { %p493_p1 = pnand %p492_p7, %p632_p9 }
  0x4a   : > { %p498_p0 = por %p497_p10, %p496_p4 }
  0x4b   : > { %p494_p2 = pneg %p493_p1 }
  0x4d   : > { %p499_p8 = pnand %p498_p0, %p494_p2 }
  0x4f   : > { %502 = shalt.err (!%p499_p8)
}
  0x50   : > { %358 = dma.vmem_to_hbm [thread:$0]  (%p632_p9), %s238_s20, 32, %s235_s29, %s222_s3  }
  0x51 PF: > { %s249_s5 = sand.u32 1, %s541_s9   ;;  %p754_p3 = scmp.ge.s32.totalorder %s561_s14, 2 }
  0x52   : > { %s250_s18 = scalar_lea.sflag [#allocation4], %s249_s5 }
  0x53   : > { %p368_p13 = pnand %p754_p3, %p639_p11 }
  0x55   : > { %p369_p5 = pneg %p368_p13 }
  0x57   : > { %536 = dma.done.wait (%p369_p5), %s250_s18, 32  }
  0x58   : > { %538 = vsyncadd (%p369_p5), %s250_s18, 4294967264  ;;  %s21_s14 = sadd.s32 1, %s561_s14   ;;  %s755_s9 = smov %s545_s10 }
  0x59   : > { %p18_p12 = scmp.ge.s32.totalorder %s21_s14, 4   ;;  %s756_s10 = smov %s549_s11 }
  0x5a   : > { %s757_s11 = smov %s637_s23  ;;  %s758_s12 = smov %s557_s13 }
  0x5b   : > { %s759_s13 = smov %s761_s17  ;;  %20 = sbr.rel (!%p18_p12) target bundleno = 8 (0x8), region = 86 }
  0x60   :  { %255 = vsyncpa [#allocation3], 1 }
  0x61   :  { %257 = vsyncpa [#allocation3 + $0x1], 1 }
  0x62   :  { %258 = vsyncpa [#allocation6], 1 }
  0x63   :  { %260 = vsyncpa [#allocation6 + $0x1], 1 }
  0x64   :  { %261 = vsyncpa [#allocation4], 1 }
  0x65   :  { %263 = vsyncpa [#allocation4 + $0x1], 1 }

</bundles_post_ra>
